<compile_context>
chip_gen: v7x
topology: tpu7x:2x2x1
jax: 0.10.0
libtpu: 0.0.40
codegen_flags: <defaults>
</compile_context>

<pallas_src>
import jax
import jax.numpy as jnp
from jax.experimental import pallas as pl
from jax.experimental.pallas import tpu as pltpu


def _round_up(x, m):
    return ((x + m - 1) // m) * m


# ---------------------------------------------------------------------------
# Kernels
# ---------------------------------------------------------------------------
def _gcn_ax_then_w_kernel(a_ref, x_ref, w_ref, b_ref, o_ref, acc_ref):
    """acc += A_tile @ X_tile over k; on last k: out = acc @ W + b."""
    k = pl.program_id(1)

    @pl.when(k == 0)
    def _():
        acc_ref[...] = jnp.zeros_like(acc_ref)

    acc_ref[...] += jnp.dot(
        a_ref[...], x_ref[...], preferred_element_type=jnp.float32
    )

    @pl.when(k == pl.num_programs(1) - 1)
    def _():
        o_ref[...] = (
            jnp.dot(acc_ref[...], w_ref[...], preferred_element_type=jnp.float32)
            + b_ref[...]
        ).astype(o_ref.dtype)


def _gcn_axw_bias_kernel(a_ref, z_ref, b_ref, o_ref, acc_ref):
    """acc += A_tile @ Z_tile over k (Z = X@W precomputed); last k: out = acc + b."""
    k = pl.program_id(1)

    @pl.when(k == 0)
    def _():
        acc_ref[...] = jnp.zeros_like(acc_ref)

    acc_ref[...] += jnp.dot(
        a_ref[...], z_ref[...], preferred_element_type=jnp.float32
    )

    @pl.when(k == pl.num_programs(1) - 1)
    def _():
        o_ref[...] = (acc_ref[...] + b_ref[...]).astype(o_ref.dtype)


# ---------------------------------------------------------------------------
# Wrapper
# ---------------------------------------------------------------------------
def gcn_conv_pallas(a_norm, x, w, b, *, tm=512, tk=1024):
    """out = A_norm @ (X @ W) + b, tiled over (row, k) with f32 accumulation.

    tm: row tile (multiple of 8);  tk: contraction tile (multiple of 128).
    Both are clipped for small graphs; operands are zero-padded to tile
    multiples (exact for this linear op) and the result is sliced back.
    """
    n, f = x.shape
    h = w.shape[1]

    # ---- matmul association order (min of F, H drives the N^2 term) ----
    project_inside = f <= h

    # ---- lane-dense output: pad H to a multiple of 128 ----
    hp = _round_up(h, 128)
    b_p = jnp.pad(b.reshape(1, -1).astype(jnp.float32), ((0, 0), (0, hp - h)))

    if project_inside:
        m = x.astype(jnp.bfloat16)                                    # [N, F]
        w_p = jnp.pad(w.astype(jnp.float32), ((0, 0), (0, hp - h)))   # [F, Hp]
        acc_cols = f
    else:
        # Small projection done once up front (O(N*F*H) << O(N^2)); the big
        # A_norm matmul streams the projected features.
        z = jnp.dot(x, w, preferred_element_type=jnp.float32)         # [N, H]
        m = jnp.pad(z, ((0, 0), (0, hp - h))).astype(jnp.bfloat16)    # [N, Hp]
        w_p = None
        acc_cols = hp

    a_bf = a_norm.astype(jnp.bfloat16)

    # ---- tile sizes (clipped for small N, alignment-safe) ----
    tm_eff = min(tm, _round_up(n, 8))      # multiple of 8
    tk_eff = min(tk, _round_up(n, 128))    # multiple of 128
    rows_p = _round_up(n, tm_eff)
    cols_p = _round_up(n, tk_eff)

    a_p = jnp.pad(a_bf, ((0, rows_p - n), (0, cols_p - n)))
    m_p = jnp.pad(m, ((0, cols_p - n), (0, 0)))
    mcols = m_p.shape[1]

    grid = (rows_p // tm_eff, cols_p // tk_eff)

    a_spec = pl.BlockSpec((tm_eff, tk_eff), lambda i, k: (i, k))
    m_spec = pl.BlockSpec((tk_eff, mcols), lambda i, k: (k, 0))
    b_spec = pl.BlockSpec((1, hp), lambda i, k: (0, 0))
    o_spec = pl.BlockSpec((tm_eff, hp), lambda i, k: (i, 0))

    cparams = pltpu.CompilerParams(
        dimension_semantics=("parallel", "arbitrary")
    )

    if project_inside:
        kernel = _gcn_ax_then_w_kernel
        in_specs = [a_spec, m_spec, pl.BlockSpec((f, hp), lambda i, k: (0, 0)), b_spec]
        operands = (a_p, m_p, w_p, b_p)
    else:
        kernel = _gcn_axw_bias_kernel
        in_specs = [a_spec, m_spec, b_spec]
        operands = (a_p, m_p, b_p)

    out_p = pl.pallas_call(
        kernel,
        out_shape=jax.ShapeDtypeStruct((rows_p, hp), jnp.float32),
        grid_spec=pltpu.PrefetchScalarGridSpec(
            num_scalar_prefetch=0,
            grid=grid,
            in_specs=in_specs,
            out_specs=o_spec,
            scratch_shapes=[pltpu.VMEM((tm_eff, acc_cols), jnp.float32)],
        ),
        compiler_params=cparams,
    )(*operands)

    return out_p[:n, :h]


def build_normalized_adjacency(edge_index, num_nodes):
    """Dense symmetric-normalized adjacency with self loops (GCNConv norm)."""
    src = edge_index[0]
    dst = edge_index[1]
    # A[target, source] = 1  (messages flow source -> target)
    adj = jnp.zeros((num_nodes, num_nodes), dtype=jnp.float32)
    adj = adj.at[dst, src].set(1.0)
    # zero the diagonal then add self loops (avoids double self-loop weight)
    adj = adj * (1.0 - jnp.eye(num_nodes, dtype=jnp.float32))
    adj = adj + jnp.eye(num_nodes, dtype=jnp.float32)
    deg = adj.sum(axis=1)
    dinv = jnp.where(deg > 0, 1.0 / jnp.sqrt(deg), 0.0)
    return dinv[:, None] * adj * dinv[None, :]


def gcn_forward(x, edge_index, weight, bias):
    """Full GCN.forward: x = gc1(x, edge_index)."""
    n = x.shape[0]
    a_norm = build_normalized_adjacency(edge_index, n)
    return gcn_conv_pallas(a_norm, x, weight, bias)


if __name__ == "__main__":
    # Small deterministic problem: N nodes, nfeat input dims, nhid hidden dims.
    N, NFEAT, NHID, E = 16, 8, 16, 32

    key = jax.random.PRNGKey(0)
    k_x, k_src, k_dst, k_w, k_b = jax.random.split(key, 5)

    # Node features [N, NFEAT]
    x = jax.random.normal(k_x, (N, NFEAT), dtype=jnp.float32)

    # Random edge_index [2, E] (no guaranteed self loops; wrapper adds them)
    src = jax.random.randint(k_src, (E,), 0, N)
    dst = jax.random.randint(k_dst, (E,), 0, N)
    edge_index = jnp.stack([src, dst], axis=0)

    # Deterministic parameter init (GCNConv: glorot-style weight, bias)
    limit = jnp.sqrt(6.0 / (NFEAT + NHID))
    weight = jax.random.uniform(
        k_w, (NFEAT, NHID), minval=-limit, maxval=limit, dtype=jnp.float32
    )
    bias = jax.random.uniform(
        k_b, (NHID,), minval=-0.1, maxval=0.1, dtype=jnp.float32
    )

    out = gcn_forward(x, edge_index, weight, bias)
    out = jax.block_until_ready(out)
    assert out.shape == (N, NHID)

    # Reference using the same bf16 casts as the kernel's streamed operands.
    a_norm = build_normalized_adjacency(edge_index, N)
    a32 = a_norm.astype(jnp.bfloat16).astype(jnp.float32)
    x32 = x.astype(jnp.bfloat16).astype(jnp.float32)
    ref = (a32 @ x32) @ weight + bias[None, :]
    assert jnp.allclose(out, ref, atol=1e-4, rtol=1e-4), float(
        jnp.max(jnp.abs(out - ref))
    )

    # Looser sanity check against full-f32 math.
    ref_f32 = a_norm @ (x @ weight) + bias[None, :]
    assert jnp.allclose(out, ref_f32, atol=5e-2, rtol=5e-2)

    print("KERNEL_OK")
</pallas_src>

<mosaic_0001>
module attributes {stable_mosaic.version = 11 : i64} {
  func.func @_gcn_ax_then_w_kernel(%arg0: i32, %arg1: i32, %arg2: memref<16x128xbf16, #tpu.memory_space<vmem>>, %arg3: memref<128x8xbf16, #tpu.memory_space<vmem>>, %arg4: memref<8x128xf32, #tpu.memory_space<vmem>>, %arg5: memref<1x128xf32, #tpu.memory_space<vmem>>, %arg6: memref<16x128xf32, #tpu.memory_space<vmem>>, %arg7: memref<16x8xf32, #tpu.memory_space<vmem>>) attributes {dimension_semantics = [#tpu.dimension_semantics<parallel>, #tpu.dimension_semantics<arbitrary>], iteration_bounds = array<i64: 1, 1>, scalar_prefetch = 0 : i64, scratch_operands = 1 : i64, tpu.core_type = #tpu.core_type<tc>, window_params = [{transform_indices = @transform_0, window_bounds = array<i64: 16, 128>}, {transform_indices = @transform_1, window_bounds = array<i64: 128, 8>}, {pipeline_mode = #tpu.pipeline_mode<synchronous>, transform_indices = @transform_2, window_bounds = array<i64: 8, 128>}, {pipeline_mode = #tpu.pipeline_mode<synchronous>, transform_indices = @transform_3, window_bounds = array<i64: 1, 128>}, {transform_indices = @transform_4, window_bounds = array<i64: 16, 128>}]} {
    %c0_i32 = arith.constant 0 : i32
    %0 = arith.cmpi eq, %arg1, %c0_i32 : i32
    %1 = arith.extui %0 : i1 to i32
    %c0_i32_0 = arith.constant 0 : i32
    %2 = arith.cmpi ne, %1, %c0_i32_0 : i32
    scf.if %2 {
      %cst_10 = arith.constant 0.000000e+00 : f32
      %12 = vector.broadcast %cst_10 : f32 to vector<16x8xf32>
      %c0_11 = arith.constant 0 : index
      %c0_12 = arith.constant 0 : index
      %13 = vector.load %arg7[%c0_11, %c0_12] : memref<16x8xf32, #tpu.memory_space<vmem>>, vector<16x8xf32>
      tpu.vector_store %arg7[%c0_11, %c0_12], %12 {strides = array<i32>} : memref<16x8xf32, #tpu.memory_space<vmem>>, vector<16x8xf32>,
    } else {
    }
    %c0 = arith.constant 0 : index
    %c0_1 = arith.constant 0 : index
    %3 = vector.load %arg7[%c0, %c0_1] : memref<16x8xf32, #tpu.memory_space<vmem>>, vector<16x8xf32>
    %c0_2 = arith.constant 0 : index
    %c0_3 = arith.constant 0 : index
    %4 = vector.load %arg2[%c0_2, %c0_3] : memref<16x128xbf16, #tpu.memory_space<vmem>>, vector<16x128xbf16>
    %c0_4 = arith.constant 0 : index
    %c0_5 = arith.constant 0 : index
    %5 = vector.load %arg3[%c0_4, %c0_5] : memref<128x8xbf16, #tpu.memory_space<vmem>>, vector<128x8xbf16>
    %cst = arith.constant dense<0.000000e+00> : vector<16x8xf32>
    %6 = tpu.matmul %4, %5, %cst {dimension_numbers = #tpu.dot_dimension_numbers<[1], [0], [0], [1], [0, 0, 1, 1], [], []>} : vector<16x128xbf16>, vector<128x8xbf16>, vector<16x8xf32> -> vector<16x8xf32>
    %7 = arith.addf %3, %6 : vector<16x8xf32>
    %c0_6 = arith.constant 0 : index
    %c0_7 = arith.constant 0 : index
    %8 = vector.load %arg7[%c0_6, %c0_7] : memref<16x8xf32, #tpu.memory_space<vmem>>, vector<16x8xf32>
    tpu.vector_store %arg7[%c0_6, %c0_7], %7 {strides = array<i32>} : memref<16x8xf32, #tpu.memory_space<vmem>>, vector<16x8xf32>,
    %c0_i32_8 = arith.constant 0 : i32
    %9 = arith.cmpi eq, %arg1, %c0_i32_8 : i32
    %10 = arith.extui %9 : i1 to i32
    %c0_i32_9 = arith.constant 0 : i32
    %11 = arith.cmpi ne, %10, %c0_i32_9 : i32
    scf.if %11 {
      %c0_10 = arith.constant 0 : index
      %c0_11 = arith.constant 0 : index
      %12 = vector.load %arg7[%c0_10, %c0_11] : memref<16x8xf32, #tpu.memory_space<vmem>>, vector<16x8xf32>
      %c0_12 = arith.constant 0 : index
      %c0_13 = arith.constant 0 : index
      %13 = vector.load %arg4[%c0_12, %c0_13] : memref<8x128xf32, #tpu.memory_space<vmem>>, vector<8x128xf32>
      %cst_14 = arith.constant dense<0.000000e+00> : vector<16x128xf32>
      %14 = tpu.matmul %12, %13, %cst_14 {dimension_numbers = #tpu.dot_dimension_numbers<[1], [0], [0], [1], [0, 0, 1, 1], [], []>} : vector<16x8xf32>, vector<8x128xf32>, vector<16x128xf32> -> vector<16x128xf32>
      %c0_15 = arith.constant 0 : index
      %c0_16 = arith.constant 0 : index
      %15 = vector.load %arg5[%c0_15, %c0_16] : memref<1x128xf32, #tpu.memory_space<vmem>>, vector<1x128xf32>
      %16 = vector.broadcast %15 : vector<1x128xf32> to vector<16x128xf32>
      %17 = arith.addf %14, %16 : vector<16x128xf32>
      %c0_17 = arith.constant 0 : index
      %c0_18 = arith.constant 0 : index
      %18 = vector.load %arg6[%c0_17, %c0_18] : memref<16x128xf32, #tpu.memory_space<vmem>>, vector<16x128xf32>
      tpu.vector_store %arg6[%c0_17, %c0_18], %17 {strides = array<i32>} : memref<16x128xf32, #tpu.memory_space<vmem>>, vector<16x128xf32>,
    } else {
    }
    return
  }
  func.func @transform_0(%arg0: i32, %arg1: i32) -> (i32, i32) {
    %c0_i32 = arith.constant 0 : i32
    return %arg0, %arg1 : i32, i32
  }
  func.func @transform_1(%arg0: i32, %arg1: i32) -> (i32, i32) {
    %c0_i32 = arith.constant 0 : i32
    %c0_i32_0 = arith.constant 0 : i32
    return %arg1, %c0_i32 : i32, i32
  }
  func.func @transform_2(%arg0: i32, %arg1: i32) -> (i32, i32) {
    %c0_i32 = arith.constant 0 : i32
    %c0_i32_0 = arith.constant 0 : i32
    %c0_i32_1 = arith.constant 0 : i32
    return %c0_i32, %c0_i32_0 : i32, i32
  }
  func.func @transform_3(%arg0: i32, %arg1: i32) -> (i32, i32) {
    %c0_i32 = arith.constant 0 : i32
    %c0_i32_0 = arith.constant 0 : i32
    %c0_i32_1 = arith.constant 0 : i32
    return %c0_i32, %c0_i32_0 : i32, i32
  }
  func.func @transform_4(%arg0: i32, %arg1: i32) -> (i32, i32) {
    %c0_i32 = arith.constant 0 : i32
    %c0_i32_0 = arith.constant 0 : i32
    return %arg0, %c0_i32 : i32, i32
  }
}

</mosaic_0001>

<bundles_post_ra>
// kernel: tpu_custom_call.1
= control target key start
LH: loop header
LB: loop body
LE: loop exit
PB: predicated region body
PF: predicated region fallthrough
CT: control target
= control target key end

     0   :  { %v345_v1 = vmov 0.0   ;;  %vm346_vm0 = vmmov 0   ;;  %vm23_vm1 = vcmask 64512   ;;  %s426_s0 = inlined_call_operand.vmem [shape: bf16[16,128], index: 0, kind: input, shape index: {}]   ;;  %s427_s1 = inlined_call_operand.vmem [shape: bf16[128,8], index: 1, kind: input, shape index: {}]   ;;  %s428_s2 = inlined_call_operand.vmem [shape: f32[8,128], index: 2, kind: input, shape index: {}]   ;;  %s429_s3 = inlined_call_operand.vmem [shape: f32[1,128], index: 3, kind: input, shape index: {}]   ;;  %s430_s4 = inlined_call_operand.hbm [shape: f32[16,128], index: 4, kind: output, shape index: {}]  }
   0x1   :  { %v312_v0 = vld [vmem:[%s427_s1] sm:$0xff]   ;;  %282 = vmatprep.subr.bf16.mxu0 %v345_v1  ;;  %v313_v2 = vld [vmem:[%s427_s1 + $0x8] sm:$0xff]   ;;  %298 = vmatprep.mubr.msk.bf16.mxu0 %vm346_vm0, %v345_v1  ;;  %24 = vst.msk [vmem:[#allocation2] sm:$0xff] %vm23_vm1, %v345_v1  ;;  %25 = vst.msk [vmem:[#allocation2 + $0x8] sm:$0xff] %vm23_vm1, %v345_v1 }
   0x2   :  { %283 = vmatpush3.bf16.msra.mxu0 %v312_v0  ;;  %v314_v3 = vld [vmem:[%s427_s1 + $0x10] sm:$0xff]  }
   0x3   :  { %284 = vmatprep.subr.bf16.mxu0 %v345_v1 }
   0x6   :  { %285 = vmatpush3.bf16.msra.mxu0 %v313_v2 }
   0x7   :  { %286 = vmatprep.subr.bf16.mxu0 %v345_v1 }
   0x8   :  { %9 = vsyncpa [#allocation4], 0  ;;  %v315_v4 = vld [vmem:[%s427_s1 + $0x18] sm:$0xff]   ;;  %v316_v5 = vld [vmem:[%s427_s1 + $0x20] sm:$0xff]  }
   0x9   :  { %v317_v6 = vld [vmem:[%s427_s1 + $0x28] sm:$0xff]   ;;  %v318_v7 = vld [vmem:[%s427_s1 + $0x30] sm:$0xff]   ;;  %v319_v8 = vld [vmem:[%s427_s1 + $0x38] sm:$0xff]  }
   0xa   :  { %287 = vmatpush3.bf16.msra.mxu0 %v314_v3  ;;  %v320_v9 = vld [vmem:[%s426_s0] sm:$0xff]   ;;  %v27_v13 = vld [vmem:[#allocation2 + $0x8] sm:$0xff] }
   0xb   :  { %288 = vmatprep.subr.bf16.mxu0 %v345_v1  ;;  %v151_v10 = vld [vmem:[%s428_s2] sm:$0xff]  ;;  %s347_s2 = smov [#allocation3]  }
   0xc   :  { %302 = vmatprep.subr.mxu1 %v151_v10  ;;  %v26_v11 = vld [vmem:[#allocation2] sm:$0xff]  ;;  %s247_s9 = sshll.u32 %s347_s2, 4  ;;  %s248_s9 = int_to_ptr.vmem [resolvable:$true] %s247_s9 }
   0xd   :  { %303 = vmatpush3.msra.mxu1 %v151_v10  ;;  %v267_v21 = vld [vmem:[%s429_s3] ss:$0 sm:$0xff]  ;;  %s321_s10 = scalar_lea.vmem %s248_s9, 256  ;;  %p326_p1 = scmp.lt.s32.totalorder %s248_s9, %s248_s9 }
   0xe   :  { %289 = vmatpush3.bf16.msra.mxu0 %v315_v4  ;;  %p322_p0 = scmp.ne.s32.totalorder %s248_s9, %s321_s10  ;;  %p327_p2 = scmp.lt.s32.totalorder %s321_s10, %s321_s10 }
   0xf   :  { %290 = vmatprep.subr.bf16.mxu0 %v345_v1 }
  0x10   :  { %p328_p3 = por %p327_p2, %p326_p1 }
  0x12   :  { %291 = vmatpush3.bf16.msra.mxu0 %v316_v5  ;;  %p329_p4 = pnand %p328_p3, %p322_p0 }
  0x13   :  { %292 = vmatprep.subr.bf16.mxu0 %v345_v1 }
  0x16   :  { %293 = vmatpush3.bf16.msra.mxu0 %v317_v6 }
  0x17   :  { %294 = vmatprep.subr.bf16.mxu0 %v345_v1 }
  0x1a   :  { %295 = vmatpush3.bf16.msra.mxu0 %v318_v7 }
  0x1b   :  { %296 = vmatprep.subr.bf16.mxu0 %v345_v1 }
  0x1e   :  { %297 = vmatpush3.bf16.msra.mxu0 %v319_v8 }
  0x21   :  { %299 = vmatmul.mubr.bf16.vlgmr.msra.gmra.mrb[0].mxu0 %v320_v9 }
  0xf4   :  { %v134_v12 = vpop.f32.mrb[0].mxu0 }
  0xf5   :  { %v141_v14 = vadd.f32 %v134_v12, %v26_v11  ;;  %v300_v15 = vpop.f32.mrb[1].mxu0 }
  0xf6   :  { %v137_v16 = vpop.f32.mrb[2].mxu0 }
  0xf7   :  { %144 = vst.msk [vmem:[#allocation2] sm:$0xff] %vm23_vm1, %v141_v14  ;;  %v142_v17 = vadd.f32 %v137_v16, %v27_v13  ;;  %v301_v18 = vpop.f32.mrb[3].mxu0 }
  0xf9   :  { %145 = vst.msk [vmem:[#allocation2 + $0x8] sm:$0xff] %vm23_vm1, %v142_v17 }
  0xfe   :  { %v149_v19 = vld [vmem:[#allocation2] sm:$0xff] }
  0xff   :  { %304 = vmatprep.mubr.msk.f32.mxu1 %vm23_vm1, %v149_v19 }
 0x100   :  { %v150_v20 = vld [vmem:[#allocation2 + $0x8] sm:$0xff] }
 0x101   :  { %305 = vmatmul.mubr.msk.f32.vlgmr.msra.gmra.mrb[0].mxu1 %vm23_vm1, %v150_v20 }
 0x1d4   :  { %v306_v22 = vpop.f32.mrb[0].mxu1 }
 0x1d5   :  { %v237_v23 = vadd.f32 %v306_v22, %v267_v21  ;;  %v231_v24 = vpop.f32.mrb[1].mxu1 }
 0x1d6   :  { %v232_v25 = vadd.f32 %v267_v21, %v231_v24 }
 0x1d7   :  { %241 = vst [vmem:[#allocation3 + $0x8] sm:$0xff] %v237_v23 }
 0x1d8   :  { %240 = vst [vmem:[#allocation3] sm:$0xff] %v232_v25 }
 0x1d9   :  { %332 = shalt.err (!%p329_p4)
}
 0x1da   :  { %s333_s3 = scalar_lea.hbm %s430_s4, 256 }
 0x1db   :  { %p334_p5 = scmp.ne.s32.totalorder %s430_s4, %s333_s3  ;;  %p337_p6 = scmp.lt.u32.totalorder %s333_s3, %s430_s4 }
 0x1dd   :  { %p339_p7 = pnand %p337_p6, %p334_p5 }
 0x1df   :  { %342 = shalt.err (!%p339_p7)
}
 0x1e0   :  { %s348_s17 = smov 128   ;;  %s349_s18 = smov 8  }
 0x1e1   :  { %253 = dma.vmem_to_hbm [thread:$0]  %s248_s9, 256, %s430_s4, [#allocation4], %s348_s17, %s348_s17, %s349_s18  }
 0x1e2   :  { %343 = dma.done.wait [#allocation4], 256  }
 0x1e3   :  { %344 = vsyncadd [#allocation4], 4294967040 }
 0x1e4   :  { %257 = vsyncpa [#allocation4], 1 }

</bundles_post_ra>
